<compile_context>
chip_gen: v7x
topology: tpu7x:2x2x1
jax: 0.10.0
libtpu: 0.0.40
codegen_flags: <defaults>
</compile_context>

<pallas_src>
import functools

import jax
import jax.numpy as jnp
import numpy as np
from jax.experimental import pallas as pl
from jax.experimental.pallas import tpu as pltpu

EPS = 1e-5


# ----------------------------- Pallas kernel ------------------------------- #

def _bn_train(acc, gamma, beta, fold, unfold, count):
    """Training-mode BatchNorm on a lane-dense (NH, W*C) f32 slab.

    Column (w*C + c) belongs to channel c.  `fold` (W*C, C) sums the W lane
    groups per channel; `unfold` (C, W*C) broadcasts per-channel factors back.
    Single-pass stats (var = E[x^2] - mean^2) in f32; sum and sum-of-squares
    share one tiny matmul, as do scale/shift.
    """
    s1 = jnp.sum(acc, axis=0, keepdims=True)                 # (1, W*C)
    s2 = jnp.sum(acc * acc, axis=0, keepdims=True)           # (1, W*C)
    stats = jnp.dot(jnp.concatenate([s1, s2], axis=0), fold,
                    preferred_element_type=jnp.float32) * (1.0 / count)  # (2, C)
    mean = stats[0:1]
    var = stats[1:2] - mean * mean
    scale = gamma * jax.lax.rsqrt(var + EPS)                  # (1, C)
    shift = beta - mean * scale                               # (1, C)
    sc_sh = jnp.dot(jnp.concatenate([scale, shift], axis=0), unfold,
                    preferred_element_type=jnp.float32)       # (2, W*C)
    return acc * sc_sh[0:1] + sc_sh[1:2]


def _basic_block_kernel(*refs, N, H, W, Cin, Cout, use_proj):
    """Fused BasicBlock forward on lane-dense 2-D slabs.

    x_ref:   (N*H, W*Cin)  f32   input slab (row = (n, h), col = w*Cin + ci)
    t1_ref:  (3*W*Cin,  W*Cout)  bf16  Toeplitz conv1 weights, dy stacked on K
    t2_ref:  (3*W*Cout, W*Cout)  bf16  Toeplitz conv2 weights, dy stacked on K
    ts_ref:  (W*Cin, W*Cout)     bf16  block-diag 1x1 shortcut (only if proj)
    g*/b*:   (1, Cout)           BN gamma / beta
    fold:    (W*Cout, Cout), unfold: (Cout, W*Cout)  BN channel fold/broadcast
    o_ref:   (N*H, W*Cout)       lane-dense output slab
    """
    if use_proj:
        (x_ref, t1_ref, t2_ref, ts_ref, g1_ref, b1_ref, g2_ref, b2_ref,
         fold_ref, unfold_ref, o_ref) = refs
    else:
        (x_ref, t1_ref, t2_ref, g1_ref, b1_ref, g2_ref, b2_ref,
         fold_ref, unfold_ref, o_ref) = refs
        ts_ref = None

    NH = N * H
    cnt = float(N * H * W)
    fold = fold_ref[...]
    unfold = unfold_ref[...]

    # Per-row image-boundary masks (first / last row of each image).
    row = jax.lax.broadcasted_iota(jnp.int32, (NH, 1), 0)
    h_idx = row % H
    is_top = h_idx == 0
    is_bot = h_idx == (H - 1)

    def conv3x3(slab, t_cat_ref):
        # dy = +-1 row shift via sublane roll (XLU) + boundary mask; the width
        # halo is folded into the weights so the LHS is the raw slab.  The 3
        # taps are concatenated along K -> one MXU matmul per conv.
        up = jnp.where(is_top, 0.0, pltpu.roll(slab, shift=1, axis=0))
        dn = jnp.where(is_bot, 0.0, pltpu.roll(slab, shift=NH - 1, axis=0))
        lhs = jnp.concatenate([up, slab, dn], axis=1).astype(jnp.bfloat16)
        return jnp.dot(lhs, t_cat_ref[...], preferred_element_type=jnp.float32)

    x = x_ref[...]                                                  # (NH, W*Cin)

    # conv1 -> BN1 -> ReLU  (h1 never leaves VMEM / registers)
    acc1 = conv3x3(x, t1_ref)                                       # (NH, W*Cout)
    h1 = jnp.maximum(
        _bn_train(acc1, g1_ref[...], b1_ref[...], fold, unfold, cnt), 0.0)

    # conv2 -> BN2
    acc2 = conv3x3(h1, t2_ref)
    h2 = _bn_train(acc2, g2_ref[...], b2_ref[...], fold, unfold, cnt)

    # shortcut: 1x1 projection iff Cin != Cout, identity otherwise
    if use_proj:
        sc = jnp.dot(x.astype(jnp.bfloat16), ts_ref[...],
                     preferred_element_type=jnp.float32)
    else:
        sc = x    # only valid when Cin == Cout (enforced by the wrapper)

    o_ref[...] = jnp.maximum(h2 + sc, 0.0).astype(o_ref.dtype)


# --------------------- one-time parameter preparation ---------------------- #

def _toeplitz_conv_weights(w_hwio, width):
    """(3,3,Cin,Cout) HWIO -> (3*W*Cin, W*Cout) banded matrix, dy stacked on K.

    T[dy*W*Cin + wi*Cin + ci, wo*Cout + co] = w[dy, wi-wo+1, ci, co] when the
    tap index is in [0,3); the width zero-padding is folded in (boundary taps
    simply vanish), so the conv matmul LHS is the un-padded (NH, W*Cin) slab.
    """
    kh, kw, cin, cout = w_hwio.shape
    wi = jnp.arange(width)[:, None]             # input-width index
    wo = jnp.arange(width)[None, :]             # output-width index
    dx = wi - wo + 1                            # (W, W) tap index
    valid = (dx >= 0) & (dx < kw)
    t = w_hwio[:, jnp.clip(dx, 0, kw - 1)]      # (3, W, W, Cin, Cout)
    t = jnp.where(valid[None, :, :, None, None], t, 0.0)
    t = jnp.transpose(t, (0, 1, 3, 2, 4))       # (3, W_in, Cin, W_out, Cout)
    return t.reshape(kh * width * cin, width * cout)


def prepare_basic_block_params(params, width):
    """Parameter preprocessing, hoisted OUT of the per-call forward jit."""
    cin, cout = params["w1"].shape[2], params["w1"].shape[3]
    fold = jnp.kron(jnp.ones((width, 1), jnp.float32),
                    jnp.eye(cout, dtype=jnp.float32))         # (W*Cout, Cout)
    prep = dict(
        t1=_toeplitz_conv_weights(params["w1"], width).astype(jnp.bfloat16),
        t2=_toeplitz_conv_weights(params["w2"], width).astype(jnp.bfloat16),
        g1=params["g1"], b1=params["b1"], g2=params["g2"], b2=params["b2"],
        fold=fold, unfold=fold.T,
    )
    if cin != cout:
        # TODO(synk): kron(eye(W), ws) is only 1/W dense; use a blocked layout
        # at production W.
        prep["ts"] = jnp.kron(jnp.eye(width, dtype=jnp.float32),
                              params["ws"]).astype(jnp.bfloat16)
    return prep


# ------------------------------ JAX wrapper -------------------------------- #

@jax.jit
def basic_block_forward(x_nchw, prep):
    """BasicBlock forward. x_nchw: (N, Cin, H, W) f32 -> (N, Cout, H, W) f32."""
    N, Cin, H, W = x_nchw.shape
    Cout = prep["g1"].shape[-1]
    use_proj = "ts" in prep
    assert use_proj == (Cin != Cout), "shortcut kind must match Cin vs Cout"

    # NCHW -> lane-dense (N*H, W*Cin) slab.
    x2d = jnp.transpose(x_nchw, (0, 2, 3, 1)).reshape(N * H, W * Cin)
    x2d = x2d.astype(jnp.float32)

    kern = functools.partial(_basic_block_kernel, N=N, H=H, W=W,
                             Cin=Cin, Cout=Cout, use_proj=use_proj)

    args = [x2d, prep["t1"], prep["t2"]]
    if use_proj:
        args.append(prep["ts"])
    args += [prep["g1"], prep["b1"], prep["g2"], prep["b2"],
             prep["fold"], prep["unfold"]]

    vmem = pl.BlockSpec(memory_space=pltpu.MemorySpace.VMEM)
    out2d = pl.pallas_call(
        kern,
        out_shape=jax.ShapeDtypeStruct((N * H, W * Cout), jnp.float32),
        in_specs=[vmem] * len(args),
        out_specs=vmem,
    )(*args)

    # (N*H, W*Cout) -> (N,H,W,Cout) is metadata-only; transpose back to NCHW.
    return jnp.transpose(out2d.reshape(N, H, W, Cout), (0, 3, 1, 2))


# ------------------------------ Reference ---------------------------------- #

def _bn_train_ref(x, g, b):
    mean = jnp.mean(x, axis=(0, 1, 2), keepdims=True)
    var = jnp.mean((x - mean) ** 2, axis=(0, 1, 2), keepdims=True)
    return (x - mean) * jax.lax.rsqrt(var + EPS) * g + b


def basic_block_reference(x_nchw, w1_hwio, w2_hwio, ws, g1, b1, g2, b2):
    x = jnp.transpose(x_nchw, (0, 2, 3, 1))
    dn = ("NHWC", "HWIO", "NHWC")
    prec = jax.lax.Precision.HIGHEST
    h = jax.lax.conv_general_dilated(x, w1_hwio, (1, 1), "SAME",
                                     dimension_numbers=dn, precision=prec)
    h = jnp.maximum(_bn_train_ref(h, g1, b1), 0.0)
    h = jax.lax.conv_general_dilated(h, w2_hwio, (1, 1), "SAME",
                                     dimension_numbers=dn, precision=prec)
    h = _bn_train_ref(h, g2, b2)
    if x.shape[-1] != w1_hwio.shape[-1]:
        sc = jnp.einsum("nhwi,io->nhwo", x, ws, precision=prec)
    else:
        sc = x
    out = jnp.maximum(h + sc, 0.0)
    return jnp.transpose(out, (0, 3, 1, 2))


# --------------------------------- Main ------------------------------------ #

if __name__ == "__main__":
    N, Cin, Cout, H, W = 2, 4, 8, 16, 16

    key = jax.random.PRNGKey(0)
    kx, kw1, kw2, kws = jax.random.split(key, 4)

    x = jax.random.normal(kx, (N, Cin, H, W), jnp.float32)

    # Synthetic parameters (PyTorch OIHW weights rearranged to HWIO).
    w1_hwio = jax.random.normal(kw1, (3, 3, Cin, Cout), jnp.float32) * 0.1
    w2_hwio = jax.random.normal(kw2, (3, 3, Cout, Cout), jnp.float32) * 0.1
    ws = jax.random.normal(kws, (Cin, Cout), jnp.float32) * 0.1
    g1 = jnp.ones((1, Cout), jnp.float32)    # BatchNorm default: weight=1
    b1 = jnp.zeros((1, Cout), jnp.float32)   #                    bias=0
    g2 = jnp.ones((1, Cout), jnp.float32)
    b2 = jnp.zeros((1, Cout), jnp.float32)

    params = dict(w1=w1_hwio, w2=w2_hwio, ws=ws, g1=g1, b1=b1, g2=g2, b2=b2)
    prep = prepare_basic_block_params(params, W)   # one-time, outside the jit

    out = jax.block_until_ready(basic_block_forward(x, prep))
    assert out.shape == (N, Cout, H, W), out.shape

    ref = jax.block_until_ready(
        basic_block_reference(x, w1_hwio, w2_hwio, ws, g1, b1, g2, b2))
    np.testing.assert_allclose(np.asarray(out), np.asarray(ref),
                               rtol=2e-2, atol=2e-2)

    print("KERNEL_OK")
</pallas_src>

<mosaic_0001>
module attributes {stable_mosaic.version = 11 : i64} {
  func.func @_basic_block_kernel(%arg0: memref<32x64xf32, #tpu.memory_space<vmem>>, %arg1: memref<192x128xbf16, #tpu.memory_space<vmem>>, %arg2: memref<384x128xbf16, #tpu.memory_space<vmem>>, %arg3: memref<64x128xbf16, #tpu.memory_space<vmem>>, %arg4: memref<1x8xf32, #tpu.memory_space<vmem>>, %arg5: memref<1x8xf32, #tpu.memory_space<vmem>>, %arg6: memref<1x8xf32, #tpu.memory_space<vmem>>, %arg7: memref<1x8xf32, #tpu.memory_space<vmem>>, %arg8: memref<128x8xf32, #tpu.memory_space<vmem>>, %arg9: memref<8x128xf32, #tpu.memory_space<vmem>>, %arg10: memref<32x128xf32, #tpu.memory_space<vmem>>) attributes {dimension_semantics = [], scalar_prefetch = 0 : i64, scratch_operands = 0 : i64, tpu.core_type = #tpu.core_type<tc>} {
    %c0 = arith.constant 0 : index
    %c0_0 = arith.constant 0 : index
    %0 = vector.load %arg8[%c0, %c0_0] : memref<128x8xf32, #tpu.memory_space<vmem>>, vector<128x8xf32>
    %c0_1 = arith.constant 0 : index
    %c0_2 = arith.constant 0 : index
    %1 = vector.load %arg9[%c0_1, %c0_2] : memref<8x128xf32, #tpu.memory_space<vmem>>, vector<8x128xf32>
    %2 = tpu.iota {dimensions = array<i32: 0>} : vector<32x1xi32>
    %c16_i32 = arith.constant 16 : i32
    %c0_i32 = arith.constant 0 : i32
    %3 = arith.cmpi eq, %c16_i32, %c0_i32 : i32
    %c1_i32 = arith.constant 1 : i32
    %4 = arith.select %3, %c1_i32, %c16_i32 : i32
    %5 = vector.broadcast %4 : i32 to vector<32x1xi32>
    %6 = arith.remsi %2, %5 : vector<32x1xi32>
    %c0_i32_3 = arith.constant 0 : i32
    %7 = vector.broadcast %c0_i32_3 : i32 to vector<32x1xi32>
    %8 = arith.cmpi ne, %6, %7 : vector<32x1xi32>
    %c0_i32_4 = arith.constant 0 : i32
    %9 = vector.broadcast %c0_i32_4 : i32 to vector<32x1xi32>
    %10 = arith.cmpi slt, %6, %9 : vector<32x1xi32>
    %c0_i32_5 = arith.constant 0 : i32
    %11 = arith.cmpi slt, %4, %c0_i32_5 : i32
    %12 = vector.broadcast %11 : i1 to vector<32x1xi1>
    %13 = vector.broadcast %12 : vector<32x1xi1> to vector<32x1xi1>
    %14 = arith.xori %10, %13 : vector<32x1xi1>
    %15 = arith.andi %14, %8 : vector<32x1xi1>
    %16 = vector.broadcast %4 : i32 to vector<32x1xi32>
    %17 = arith.addi %6, %16 : vector<32x1xi32>
    %18 = arith.select %15, %17, %6 : vector<32x1xi1>, vector<32x1xi32>
    %c0_i32_6 = arith.constant 0 : i32
    %19 = vector.broadcast %c0_i32_6 : i32 to vector<32x1xi32>
    %20 = arith.cmpi eq, %18, %19 : vector<32x1xi32>
    %c15_i32 = arith.constant 15 : i32
    %21 = vector.broadcast %c15_i32 : i32 to vector<32x1xi32>
    %22 = arith.cmpi eq, %18, %21 : vector<32x1xi32>
    %c0_7 = arith.constant 0 : index
    %c0_8 = arith.constant 0 : index
    %23 = vector.load %arg0[%c0_7, %c0_8] : memref<32x64xf32, #tpu.memory_space<vmem>>, vector<32x64xf32>
    %c1_i32_9 = arith.constant 1 : i32
    %24 = tpu.dynamic_rotate %23 by %c1_i32_9 dim 0 : vector<32x64xf32>, i32 -> vector<32x64xf32>
    %cst = arith.constant 0.000000e+00 : f32
    %25 = vector.shape_cast %20 : vector<32x1xi1> to vector<32x1xi1>
    %26 = vector.broadcast %25 : vector<32x1xi1> to vector<32x64xi1>
    %27 = vector.broadcast %cst : f32 to vector<32x64xf32>
    %28 = arith.select %26, %27, %24 : vector<32x64xi1>, vector<32x64xf32>
    %c31_i32 = arith.constant 31 : i32
    %29 = tpu.dynamic_rotate %23 by %c31_i32 dim 0 : vector<32x64xf32>, i32 -> vector<32x64xf32>
    %cst_10 = arith.constant 0.000000e+00 : f32
    %30 = vector.shape_cast %22 : vector<32x1xi1> to vector<32x1xi1>
    %31 = vector.broadcast %30 : vector<32x1xi1> to vector<32x64xi1>
    %32 = vector.broadcast %cst_10 : f32 to vector<32x64xf32>
    %33 = arith.select %31, %32, %29 : vector<32x64xi1>, vector<32x64xf32>
    %34 = tpu.concatenate %28, %23, %33 in 1 : vector<32x64xf32>, vector<32x64xf32>, vector<32x64xf32> -> vector<32x192xf32>
    %35 = arith.truncf %34 : vector<32x192xf32> to vector<32x192xbf16>
    %c0_11 = arith.constant 0 : index
    %c0_12 = arith.constant 0 : index
    %36 = vector.load %arg1[%c0_11, %c0_12] : memref<192x128xbf16, #tpu.memory_space<vmem>>, vector<192x128xbf16>
    %cst_13 = arith.constant dense<0.000000e+00> : vector<32x128xf32>
    %37 = tpu.matmul %35, %36, %cst_13 {dimension_numbers = #tpu.dot_dimension_numbers<[1], [0], [0], [1], [0, 0, 1, 1], [], []>} : vector<32x192xbf16>, vector<192x128xbf16>, vector<32x128xf32> -> vector<32x128xf32>
    %c0_14 = arith.constant 0 : index
    %c0_15 = arith.constant 0 : index
    %38 = vector.load %arg4[%c0_14, %c0_15] : memref<1x8xf32, #tpu.memory_space<vmem>>, vector<1x8xf32>
    %c0_16 = arith.constant 0 : index
    %c0_17 = arith.constant 0 : index
    %39 = vector.load %arg5[%c0_16, %c0_17] : memref<1x8xf32, #tpu.memory_space<vmem>>, vector<1x8xf32>
    %cst_18 = arith.constant dense<0.000000e+00> : vector<128xf32>
    %40 = vector.multi_reduction <add>, %37, %cst_18 [0] : vector<32x128xf32> to vector<128xf32>
    %41 = vector.shape_cast %40 : vector<128xf32> to vector<1x128xf32>
    %42 = arith.mulf %37, %37 : vector<32x128xf32>
    %cst_19 = arith.constant dense<0.000000e+00> : vector<128xf32>
    %43 = vector.multi_reduction <add>, %42, %cst_19 [0] : vector<32x128xf32> to vector<128xf32>
    %44 = vector.shape_cast %43 : vector<128xf32> to vector<1x128xf32>
    %45 = tpu.concatenate %41, %44 in 0 : vector<1x128xf32>, vector<1x128xf32> -> vector<2x128xf32>
    %cst_20 = arith.constant dense<0.000000e+00> : vector<2x8xf32>
    %46 = tpu.matmul %45, %0, %cst_20 {dimension_numbers = #tpu.dot_dimension_numbers<[1], [0], [0], [1], [0, 0, 1, 1], [], []>} : vector<2x128xf32>, vector<128x8xf32>, vector<2x8xf32> -> vector<2x8xf32>
    %cst_21 = arith.constant 0.001953125 : f32
    %47 = vector.broadcast %cst_21 : f32 to vector<2x8xf32>
    %48 = arith.mulf %46, %47 : vector<2x8xf32>
    %49 = vector.extract_strided_slice %48 {offsets = [0, 0], sizes = [1, 8], strides = [1, 1]} : vector<2x8xf32> to vector<1x8xf32>
    %50 = vector.extract_strided_slice %48 {offsets = [1, 0], sizes = [1, 8], strides = [1, 1]} : vector<2x8xf32> to vector<1x8xf32>
    %51 = arith.mulf %49, %49 : vector<1x8xf32>
    %52 = arith.subf %50, %51 : vector<1x8xf32>
    %cst_22 = arith.constant 9.99999974E-6 : f32
    %53 = vector.broadcast %cst_22 : f32 to vector<1x8xf32>
    %54 = arith.addf %52, %53 : vector<1x8xf32>
    %55 = math.rsqrt %54 : vector<1x8xf32>
    %56 = arith.mulf %38, %55 : vector<1x8xf32>
    %57 = arith.mulf %49, %56 : vector<1x8xf32>
    %58 = arith.subf %39, %57 : vector<1x8xf32>
    %59 = tpu.concatenate %56, %58 in 0 : vector<1x8xf32>, vector<1x8xf32> -> vector<2x8xf32>
    %cst_23 = arith.constant dense<0.000000e+00> : vector<2x128xf32>
    %60 = tpu.matmul %59, %1, %cst_23 {dimension_numbers = #tpu.dot_dimension_numbers<[1], [0], [0], [1], [0, 0, 1, 1], [], []>} : vector<2x8xf32>, vector<8x128xf32>, vector<2x128xf32> -> vector<2x128xf32>
    %61 = vector.extract_strided_slice %60 {offsets = [0, 0], sizes = [1, 128], strides = [1, 1]} : vector<2x128xf32> to vector<1x128xf32>
    %62 = vector.broadcast %61 : vector<1x128xf32> to vector<32x128xf32>
    %63 = arith.mulf %37, %62 : vector<32x128xf32>
    %64 = vector.extract_strided_slice %60 {offsets = [1, 0], sizes = [1, 128], strides = [1, 1]} : vector<2x128xf32> to vector<1x128xf32>
    %65 = vector.broadcast %64 : vector<1x128xf32> to vector<32x128xf32>
    %66 = arith.addf %63, %65 : vector<32x128xf32>
    %cst_24 = arith.constant 0.000000e+00 : f32
    %67 = vector.broadcast %cst_24 : f32 to vector<32x128xf32>
    %68 = arith.maximumf %66, %67 : vector<32x128xf32>
    %c1_i32_25 = arith.constant 1 : i32
    %69 = tpu.dynamic_rotate %68 by %c1_i32_25 dim 0 : vector<32x128xf32>, i32 -> vector<32x128xf32>
    %cst_26 = arith.constant 0.000000e+00 : f32
    %70 = vector.shape_cast %20 : vector<32x1xi1> to vector<32x1xi1>
    %71 = vector.broadcast %70 : vector<32x1xi1> to vector<32x128xi1>
    %72 = vector.broadcast %cst_26 : f32 to vector<32x128xf32>
    %73 = arith.select %71, %72, %69 : vector<32x128xi1>, vector<32x128xf32>
    %c31_i32_27 = arith.constant 31 : i32
    %74 = tpu.dynamic_rotate %68 by %c31_i32_27 dim 0 : vector<32x128xf32>, i32 -> vector<32x128xf32>
    %cst_28 = arith.constant 0.000000e+00 : f32
    %75 = vector.shape_cast %22 : vector<32x1xi1> to vector<32x1xi1>
    %76 = vector.broadcast %75 : vector<32x1xi1> to vector<32x128xi1>
    %77 = vector.broadcast %cst_28 : f32 to vector<32x128xf32>
    %78 = arith.select %76, %77, %74 : vector<32x128xi1>, vector<32x128xf32>
    %79 = tpu.concatenate %73, %68, %78 in 1 : vector<32x128xf32>, vector<32x128xf32>, vector<32x128xf32> -> vector<32x384xf32>
    %80 = arith.truncf %79 : vector<32x384xf32> to vector<32x384xbf16>
    %c0_29 = arith.constant 0 : index
    %c0_30 = arith.constant 0 : index
    %81 = vector.load %arg2[%c0_29, %c0_30] : memref<384x128xbf16, #tpu.memory_space<vmem>>, vector<384x128xbf16>
    %cst_31 = arith.constant dense<0.000000e+00> : vector<32x128xf32>
    %82 = tpu.matmul %80, %81, %cst_31 {dimension_numbers = #tpu.dot_dimension_numbers<[1], [0], [0], [1], [0, 0, 1, 1], [], []>} : vector<32x384xbf16>, vector<384x128xbf16>, vector<32x128xf32> -> vector<32x128xf32>
    %c0_32 = arith.constant 0 : index
    %c0_33 = arith.constant 0 : index
    %83 = vector.load %arg6[%c0_32, %c0_33] : memref<1x8xf32, #tpu.memory_space<vmem>>, vector<1x8xf32>
    %c0_34 = arith.constant 0 : index
    %c0_35 = arith.constant 0 : index
    %84 = vector.load %arg7[%c0_34, %c0_35] : memref<1x8xf32, #tpu.memory_space<vmem>>, vector<1x8xf32>
    %cst_36 = arith.constant dense<0.000000e+00> : vector<128xf32>
    %85 = vector.multi_reduction <add>, %82, %cst_36 [0] : vector<32x128xf32> to vector<128xf32>
    %86 = vector.shape_cast %85 : vector<128xf32> to vector<1x128xf32>
    %87 = arith.mulf %82, %82 : vector<32x128xf32>
    %cst_37 = arith.constant dense<0.000000e+00> : vector<128xf32>
    %88 = vector.multi_reduction <add>, %87, %cst_37 [0] : vector<32x128xf32> to vector<128xf32>
    %89 = vector.shape_cast %88 : vector<128xf32> to vector<1x128xf32>
    %90 = tpu.concatenate %86, %89 in 0 : vector<1x128xf32>, vector<1x128xf32> -> vector<2x128xf32>
    %cst_38 = arith.constant dense<0.000000e+00> : vector<2x8xf32>
    %91 = tpu.matmul %90, %0, %cst_38 {dimension_numbers = #tpu.dot_dimension_numbers<[1], [0], [0], [1], [0, 0, 1, 1], [], []>} : vector<2x128xf32>, vector<128x8xf32>, vector<2x8xf32> -> vector<2x8xf32>
    %cst_39 = arith.constant 0.001953125 : f32
    %92 = vector.broadcast %cst_39 : f32 to vector<2x8xf32>
    %93 = arith.mulf %91, %92 : vector<2x8xf32>
    %94 = vector.extract_strided_slice %93 {offsets = [0, 0], sizes = [1, 8], strides = [1, 1]} : vector<2x8xf32> to vector<1x8xf32>
    %95 = vector.extract_strided_slice %93 {offsets = [1, 0], sizes = [1, 8], strides = [1, 1]} : vector<2x8xf32> to vector<1x8xf32>
    %96 = arith.mulf %94, %94 : vector<1x8xf32>
    %97 = arith.subf %95, %96 : vector<1x8xf32>
    %cst_40 = arith.constant 9.99999974E-6 : f32
    %98 = vector.broadcast %cst_40 : f32 to vector<1x8xf32>
    %99 = arith.addf %97, %98 : vector<1x8xf32>
    %100 = math.rsqrt %99 : vector<1x8xf32>
    %101 = arith.mulf %83, %100 : vector<1x8xf32>
    %102 = arith.mulf %94, %101 : vector<1x8xf32>
    %103 = arith.subf %84, %102 : vector<1x8xf32>
    %104 = tpu.concatenate %101, %103 in 0 : vector<1x8xf32>, vector<1x8xf32> -> vector<2x8xf32>
    %cst_41 = arith.constant dense<0.000000e+00> : vector<2x128xf32>
    %105 = tpu.matmul %104, %1, %cst_41 {dimension_numbers = #tpu.dot_dimension_numbers<[1], [0], [0], [1], [0, 0, 1, 1], [], []>} : vector<2x8xf32>, vector<8x128xf32>, vector<2x128xf32> -> vector<2x128xf32>
    %106 = vector.extract_strided_slice %105 {offsets = [0, 0], sizes = [1, 128], strides = [1, 1]} : vector<2x128xf32> to vector<1x128xf32>
    %107 = vector.broadcast %106 : vector<1x128xf32> to vector<32x128xf32>
    %108 = arith.mulf %82, %107 : vector<32x128xf32>
    %109 = vector.extract_strided_slice %105 {offsets = [1, 0], sizes = [1, 128], strides = [1, 1]} : vector<2x128xf32> to vector<1x128xf32>
    %110 = vector.broadcast %109 : vector<1x128xf32> to vector<32x128xf32>
    %111 = arith.addf %108, %110 : vector<32x128xf32>
    %112 = arith.truncf %23 : vector<32x64xf32> to vector<32x64xbf16>
    %c0_42 = arith.constant 0 : index
    %c0_43 = arith.constant 0 : index
    %113 = vector.load %arg3[%c0_42, %c0_43] : memref<64x128xbf16, #tpu.memory_space<vmem>>, vector<64x128xbf16>
    %cst_44 = arith.constant dense<0.000000e+00> : vector<32x128xf32>
    %114 = tpu.matmul %112, %113, %cst_44 {dimension_numbers = #tpu.dot_dimension_numbers<[1], [0], [0], [1], [0, 0, 1, 1], [], []>} : vector<32x64xbf16>, vector<64x128xbf16>, vector<32x128xf32> -> vector<32x128xf32>
    %115 = arith.addf %111, %114 : vector<32x128xf32>
    %cst_45 = arith.constant 0.000000e+00 : f32
    %116 = vector.broadcast %cst_45 : f32 to vector<32x128xf32>
    %117 = arith.maximumf %115, %116 : vector<32x128xf32>
    %c0_46 = arith.constant 0 : index
    %c0_47 = arith.constant 0 : index
    %118 = vector.load %arg10[%c0_46, %c0_47] : memref<32x128xf32, #tpu.memory_space<vmem>>, vector<32x128xf32>
    tpu.vector_store %arg10[%c0_46, %c0_47], %117 {strides = array<i32>} : memref<32x128xf32, #tpu.memory_space<vmem>>, vector<32x128xf32>,
    return
  }
}

</mosaic_0001>

<bundles_post_ra>
// kernel: basic_block_forward.1
= control target key start
LH: loop header
LB: loop body
LE: loop exit
PB: predicated region body
PF: predicated region fallthrough
CT: control target
= control target key end

     0   :  { %v53_v0 = vlaneseq  ;;  %v1570_v4 = vmov 0   ;;  %s1571_s23 = smov 64   ;;  %vm176_vm2 = vcmask 523264   ;;  %v1572_v32 = vmov 0.0|0.0   ;;  %s2100_s0 = inlined_call_operand.vmem [shape: f32[32,64], index: 0, kind: input, shape index: {}]   ;;  %s2101_s1 = inlined_call_operand.vmem [shape: bf16[192,128], index: 1, kind: input, shape index: {}]   ;;  %s2102_s8 = inlined_call_operand.vmem [shape: f32[128,8], index: 8, kind: input, shape index: {}]   ;;  %s2103_s9 = inlined_call_operand.vmem [shape: f32[8,128], index: 9, kind: input, shape index: {}]   ;;  %s2104_s2 = inlined_call_operand.vmem [shape: bf16[384,128], index: 2, kind: input, shape index: {}]   ;;  %s2105_s4 = inlined_call_operand.vmem [shape: f32[1,8], index: 4, kind: input, shape index: {}]   ;;  %s2106_s5 = inlined_call_operand.vmem [shape: f32[1,8], index: 5, kind: input, shape index: {}]   ;;  %s2107_s3 = inlined_call_operand.vmem [shape: bf16[64,128], index: 3, kind: input, shape index: {}]   ;;  %s2108_s6 = inlined_call_operand.vmem [shape: f32[1,8], index: 6, kind: input, shape index: {}]   ;;  %s2109_s7 = inlined_call_operand.vmem [shape: f32[1,8], index: 7, kind: input, shape index: {}]   ;;  %s2110_s10 = inlined_call_operand.vmem [shape: f32[32,128], index: 10, kind: output, shape index: {}]  }
   0x1   :  { %v1635_v1 = vld [vmem:[%s2100_s0] sm:$0xff]  ;;  %v1640_v2 = vld [vmem:[%s2100_s0 + $0x8] sm:$0xff]  ;;  %v1645_v3 = vld [vmem:[%s2100_s0 + $0x10] sm:$0xff]  ;;  %287 = vmatprep.subr.bf16.mxu0 %v1570_v4  ;;  %1461 = vmatprep.subr.bf16.mxu1 %v1572_v32  ;;  %vm1573_vm7 = vmmov 0   ;;  %vm360_vm8 = vcmask 1040384   ;;  %vm467_vm9 = vcmask 64512  }
   0x2   :  { %v1516_v5 = vpack.i.bf16 %v1640_v2, %v1635_v1  ;;  %v1653_v6 = vld [vmem:[%s2100_s0 + $0x18] sm:$0xff]  ;;  %v1526_v7 = vld [vmem:[%s2101_s1] sm:$0xff]   ;;  %v1527_v9 = vld [vmem:[%s2101_s1 + $0x8] sm:$0xff]   ;;  %v1663_v10 = vshrl.u32 %v53_v0, 7  ;;  %v139_v13 = vrot.slane %v1635_v1, 1  ;;  %v140_v15 = vrot.slane %v1640_v2, 1 }
   0x3   :  { %v1521_v8 = vpack.i.bf16 %v1653_v6, %v1645_v3  ;;  %288 = vmatpush1.bf16.msra.mxu0 %v1526_v7  ;;  %v1528_v12 = vld [vmem:[%s2101_s1 + $0x10] sm:$0xff]   ;;  %v141_v16 = vrot.slane %v1645_v3, 1  ;;  %v142_v18 = vrot.slane %v1653_v6, 1  ;;  %v1529_v19 = vld [vmem:[%s2101_s1 + $0x18] sm:$0xff]   ;;  %v36_v25 = vld [vmem:[%s2102_s8] sm:$0xff]  ;;  %v118_v43 = vrot.slane %v1635_v1, 7 }
   0x4   :  { %1517 = vrot.lane.b32.xlu0 %v1516_v5, %s1571_s23  ;;  %289 = vmatprep.subr.bf16.mxu0 %v1570_v4  ;;  %v55_v11 = vadd.s32 8, %v1663_v10  ;;  %vm143_vm1 = vcmp.lt.s32.totalorder %v1663_v10, 7  ;;  %v57_v24 = vadd.s32 24, %v1663_v10  ;;  %v37_v26 = vld [vmem:[%s2102_s8 + $0x8] sm:$0xff]  ;;  %v1530_v27 = vld [vmem:[%s2101_s1 + $0x20] sm:$0xff]   ;;  %v1532_v37 = vld [vmem:[%s2101_s1 + $0x30] sm:$0xff]  }
   0x5   :  { %v145_v20 = vsel %vm143_vm1, %v140_v15, %v141_v16  ;;  %v146_v21 = vsel %vm143_vm1, %v139_v13, %v140_v15  ;;  %v147_v29 = vsel %vm143_vm1, %v142_v18, %v139_v13  ;;  %v1703_v30 = vpack.c.bf16 %v37_v26, %v36_v25  ;;  %v1531_v35 = vld [vmem:[%s2101_s1 + $0x28] sm:$0xff]   ;;  %v1533_v38 = vld [vmem:[%s2101_s1 + $0x38] sm:$0xff]   ;;  %v1534_v39 = vld [vmem:[%s2101_s1 + $0x40] sm:$0xff]  }
   0x6   :  { %v69_v14 = vand.u32 15, %v55_v11  ;;  %v83_v28 = vand.u32 15, %v57_v24  ;;  %v144_v31 = vsel %vm143_vm1, %v141_v16, %v142_v18  ;;  %v1535_v40 = vld [vmem:[%s2101_s1 + $0x48] sm:$0xff]   ;;  %v1536_v41 = vld [vmem:[%s2101_s1 + $0x50] sm:$0xff]   ;;  %v1537_v42 = vld [vmem:[%s2101_s1 + $0x58] sm:$0xff]   ;;  %v121_v44 = vrot.slane %v1653_v6, 7 }
   0x7   :  { %290 = vmatpush1.bf16.msra.mxu0 %v1527_v9  ;;  %1463 = vmatpush3.bf16.msra.mxu1 %v1703_v30  ;;  %v62_v45 = vand.u32 15, %v1663_v10  ;;  %v56_v46 = vadd.s32 16, %v1663_v10  ;;  %vm122_vm4 = vcmp.lt.s32.totalorder %v1663_v10, 1  ;;  %v119_v47 = vrot.slane %v1640_v2, 7  ;;  %v38_v11 = vld [vmem:[%s2102_s8 + $0x10] sm:$0xff]  ;;  %v41_v15 = vld [vmem:[%s2102_s8 + $0x28] sm:$0xff] }
   0x8   :  { %1522 = vrot.lane.b32.xlu0 %v1521_v8, %s1571_s23  ;;  %291 = vmatprep.subr.bf16.mxu0 %v1570_v4  ;;  %vm1674_vm0 = vcmp.eq.s32.totalorder %v69_v14, 15  ;;  %vm1709_vm3 = vcmp.eq.s32.totalorder %v83_v28, 15  ;;  %v126_v49 = vsel %vm122_vm4, %v121_v44, %v118_v43  ;;  %v120_v51 = vrot.slane %v1645_v3, 7  ;;  %v40_v14 = vld [vmem:[%s2102_s8 + $0x20] sm:$0xff]  ;;  %v42_v18 = vld [vmem:[%s2102_s8 + $0x30] sm:$0xff]  ;;  %v47_v25 = vld [vmem:[%s2102_s8 + $0x58] sm:$0xff] }
   0x9   :  { %v157_v22 = vsel %vm1674_vm0, 0.0, %v145_v20  ;;  %v159_v34 = vsel %vm1709_vm3, 0.0, %v147_v29  ;;  %1464 = vmatprep.subr.bf16.mxu1 %v1572_v32  ;;  %vm1751_vm5 = vcmp.eq.s32.totalorder %v62_v45, 0  ;;  %v76_v50 = vand.u32 15, %v56_v46  ;;  %v46_v24 = vld [vmem:[%s2102_s8 + $0x50] sm:$0xff]  ;;  %v49_v28 = vld [vmem:[%s2102_s8 + $0x68] sm:$0xff]  ;;  %vm1252_vm11 = vmneg %vm1674_vm0 }
   0xa   :  { %v182_v23 = vpack.c.bf16 %v157_v22, %v146_v21  ;;  %v184_v36 = vpack.c.bf16 %v159_v34, %v144_v31  ;;  %v125_v53 = vsel %vm122_vm4, %v118_v43, %v119_v47  ;;  %v135_v54 = vsel %vm1751_vm5, 0.0, %v126_v49  ;;  %v44_v21 = vld [vmem:[%s2102_s8 + $0x40] sm:$0xff]  ;;  %v45_v22 = vld [vmem:[%s2102_s8 + $0x48] sm:$0xff]  ;;  %v50_v31 = vld [vmem:[%s2102_s8 + $0x70] sm:$0xff] }
   0xb   :  { %292 = vmatpush1.bf16.msra.mxu0 %v1528_v12  ;;  %vm1762_vm6 = vcmp.eq.s32.totalorder %v76_v50, 0  ;;  %v124_v58 = vsel %vm122_vm4, %v119_v47, %v120_v51  ;;  %v123_v63 = vsel %vm122_vm4, %v120_v51, %v121_v44  ;;  %v39_v12 = vld [vmem:[%s2102_s8 + $0x18] sm:$0xff]  ;;  %v1793_v16 = vpack.c.bf16 %v41_v15, %v40_v14  ;;  %v1540_v14 = vld [vmem:[%s2104_s2 + $0x80] sm:$0xff]   ;;  %v1543_v15 = vld [vmem:[%s2104_s2 + $0x88] sm:$0xff]  }
   0xc   :  { %293 = vmatprep.subr.bf16.mxu0 %v1570_v4  ;;  %1217 = vmatprep.mubr.msk.bf16.mxu0 %vm176_vm2, %v182_v23  ;;  %v137_v0 = vsel %vm1762_vm6, 0.0, %v124_v58  ;;  %v1783_v13 = vpack.c.bf16 %v39_v12, %v38_v11  ;;  %v1813_v23 = vpack.c.bf16 %v45_v22, %v44_v21  ;;  %v1823_v26 = vpack.c.bf16 %v47_v25, %v46_v24  ;;  %v51_v34 = vld [vmem:[%s2102_s8 + $0x78] sm:$0xff]  ;;  %v1875_v11 = vld [vmem:[%s2103_s9] sm:$0xff]  ;;  %vm1244_vm10 = vmneg %vm1751_vm5 }
   0xd   :  { %v1538_v12 = vld [vmem:[%s2104_s2 + $0x40] sm:$0xff]   ;;  %vm1256_vm12 = vmneg %vm1709_vm3  ;;  %vm1576_vm13 = vmmov 1  }
   0xe   :  { %1466 = vmatpush3.bf16.msra.mxu1 %v1783_v13  ;;  %v1552_v21 = vld [vmem:[%s2104_s2 + $0xa0] sm:$0xff]   ;;  %vm1245_vm14 = vmpackc.low %vm1576_vm13, %vm1244_vm10 }
   0xf   :  { %294 = vmatpush1.bf16.msra.mxu0 %v1529_v19  ;;  %1467 = vmatprep.subr.bf16.mxu1 %v1572_v32  ;;  %v43_v19 = vld [vmem:[%s2102_s8 + $0x38] sm:$0xff]  ;;  %vm1253_vm15 = vmpackc.low %vm1252_vm11, %vm1576_vm13 }
  0x10   :  { %295 = vmatprep.subr.bf16.mxu0 %v1570_v4  ;;  %v1803_v20 = vpack.c.bf16 %v43_v19, %v42_v18  ;;  %v1546_v18 = vld [vmem:[%s2104_s2 + $0x90] sm:$0xff]   ;;  %v1549_v19 = vld [vmem:[%s2104_s2 + $0x98] sm:$0xff]   ;;  %vm1257_vm5 = vmpackc.low %vm1256_vm12, %vm1576_vm13 }
  0x11   :  { %vm1248_vm0 = vmneg %vm1762_vm6 }
  0x12   :  { %1469 = vmatpush3.bf16.msra.mxu1 %v1793_v16 }
  0x13   :  { %296 = vmatpush1.bf16.msra.mxu0 %v1530_v27  ;;  %1470 = vmatprep.subr.bf16.mxu1 %v1572_v32  ;;  %v48_v27 = vld [vmem:[%s2102_s8 + $0x60] sm:$0xff] }
  0x14   :  { %297 = vmatprep.subr.bf16.mxu0 %v1570_v4  ;;  %v1833_v29 = vpack.c.bf16 %v49_v28, %v48_v27 }
  0x16   :  { %1472 = vmatpush3.bf16.msra.mxu1 %v1803_v20 }
  0x17   :  { %298 = vmatpush1.bf16.msra.mxu0 %v1531_v35  ;;  %1473 = vmatprep.subr.bf16.mxu1 %v1572_v32  ;;  %v1574_v35 = vmov 0.0  }
  0x18   :  { %299 = vmatprep.subr.bf16.mxu0 %v1570_v4  ;;  %1381 = vmatprep.mubr.msk.f32.mxu1 %vm1573_vm7, %v1574_v35 }
  0x1a   :  { %1475 = vmatpush3.bf16.msra.mxu1 %v1813_v23 }
  0x1b   :  { %300 = vmatpush1.bf16.msra.mxu0 %v1532_v37  ;;  %1476 = vmatprep.subr.bf16.mxu1 %v1572_v32 }
  0x1c   :  { %301 = vmatprep.subr.bf16.mxu0 %v1570_v4 }
  0x1e   :  { %1478 = vmatpush3.bf16.msra.mxu1 %v1823_v26 }
  0x1f   :  { %302 = vmatpush1.bf16.msra.mxu0 %v1533_v38  ;;  %1479 = vmatprep.subr.bf16.mxu1 %v1572_v32 }
  0x20   :  { %303 = vmatprep.subr.bf16.mxu0 %v1570_v4 }
  0x22   :  { %1481 = vmatpush3.bf16.msra.mxu1 %v1833_v29 }
  0x23   :  { %304 = vmatpush1.bf16.msra.mxu0 %v1534_v39  ;;  %1482 = vmatprep.subr.bf16.mxu1 %v1572_v32 }
  0x24   :  { %305 = vmatprep.subr.bf16.mxu0 %v1570_v4 }
  0x27   :  { %306 = vmatpush1.bf16.msra.mxu0 %v1535_v40 }
  0x28   :  { %307 = vmatprep.subr.bf16.mxu0 %v1570_v4 }
  0x2b   :  { %308 = vmatpush1.bf16.msra.mxu0 %v1536_v41 }
  0x2c   :  { %309 = vmatprep.subr.bf16.mxu0 %v1570_v4 }
  0x2f   :  { %310 = vmatpush1.bf16.msra.mxu0 %v1537_v42 }
  0x30   :  { %1389 = vmatprep.subr.bf16.mxu0 %v1540_v14 }
  0x76   :  { %v1518_v52 = vpop.permute.xlu0 %1517 }
  0x77   :  { %v1520_v55 = vunpack.i.h.bf16 %v1518_v52  ;;  %v1519_v56 = vunpack.i.l.bf16 %v1518_v52 }
  0x79   :  { %v177_v59 = vsel %vm176_vm2, %v135_v54, %v1519_v56  ;;  %v178_v60 = vsel %vm176_vm2, %v125_v53, %v1520_v55 }
  0x7a   :  { %v181_v61 = vpack.c.bf16 %v178_v60, %v177_v59  ;;  %v1523_v62 = vpop.permute.xlu0 %1522 }
  0x7b   :  { %v1525_v4 = vunpack.i.h.bf16 %v1523_v62  ;;  %v1524_v5 = vunpack.i.l.bf16 %v1523_v62 }
  0x7c   :  { %320 = vmatmul.mubr.bf16.vlgmr.msra.gmra.mrb[0].mxu0 %v181_v61 }
  0x7d   :  { %1218 = vmatprep.mubr.msk.bf16.mxu0 %vm176_vm2, %v184_v36  ;;  %v179_v7 = vsel %vm176_vm2, %v137_v0, %v1524_v5  ;;  %v180_v8 = vsel %vm176_vm2, %v123_v63, %v1525_v4  ;;  %v1844_v36 = vpack.c.bf16 %v51_v34, %v50_v31  ;;  %1390 = vmatpush3.bf16.msra.mxu0 %v1540_v14  ;;  %v1556_v14 = vld [vmem:[%s2104_s2 + $0x70] sm:$0xff]  }
  0x7e   :  { %v183_v9 = vpack.c.bf16 %v180_v8, %v179_v7  ;;  %1391 = vmatprep.subr.bf16.mxu0 %v1543_v15 }
  0x7f   :  { %1484 = vmatpush3.bf16.msra.mxu1 %v1844_v36 }
  0x80   :  { %1384 = vmatprep.subr.mxu1 %v1574_v35 }
  0x81   :  { %1392 = vmatpush3.bf16.msra.mxu0 %v1543_v15  ;;  %v1557_v15 = vld [vmem:[%s2104_s2 + $0x30] sm:$0xff]  }
  0x82   :  { %1393 = vmatprep.subr.bf16.mxu0 %v1546_v18 }
  0x84   :  { %328 = vmatmul.mubr.bf16.gmra.mrb[4].mxu0 %v183_v9 }
  0x85   :  { %1394 = vmatpush3.bf16.msra.mxu0 %v1546_v18  ;;  %v1558_v18 = vld [vmem:[%s2104_s2 + $0xb0] sm:$0xff]  }
  0x86   :  { %1395 = vmatprep.subr.bf16.mxu0 %v1549_v19 }
  0x89   :  { %1396 = vmatpush3.bf16.msra.mxu0 %v1549_v19  ;;  %v1559_v19 = vld [vmem:[%s2104_s2 + $0x78] sm:$0xff]  }
  0x8a   :  { %1397 = vmatprep.subr.bf16.mxu0 %v1552_v21 }
  0x8d   :  { %1398 = vmatpush3.bf16.msra.mxu0 %v1552_v21  ;;  %v1560_v21 = vld [vmem:[%s2104_s2 + $0x38] sm:$0xff]  }
 0x14f   :  { %v1849_v37 = vpop.f32.mrb[0].mxu0 }
 0x150   :  { %v323_v38 = vpop.f32.mrb[1].mxu0  ;;  %v347_v40 = vmul.f32 %v1849_v37, %v1849_v37 }
 0x151   :  { %v1851_v39 = vpop.f32.mrb[2].mxu0  ;;  %v1575_v38 = vmov 1966171168  }
 0x152   :  { %v338_v41 = vadd.f32 %v1851_v39, %v1849_v37  ;;  %v348_v42 = vmul.f32 %v1851_v39, %v1851_v39  ;;  %v326_v43 = vpop.f32.mrb[3].mxu0 }
 0x154   :  { %v351_v44 = vadd.f32 %v348_v42, %v347_v40  ;;  %v442_v40 = vunpack.c.l.s4 %v1575_v38 }
 0x157   :  { %v1859_v45 = vpop.f32.mrb[4].mxu0 }
 0x158   :  { %v339_v46 = vadd.f32 %v338_v41, %v1859_v45  ;;  %v349_v47 = vmul.f32 %v1859_v45, %v1859_v45  ;;  %v331_v49 = vpop.f32.mrb[5].mxu0  ;;  %v443_v41 = vunpack.c.0.s8 %v442_v40 }
 0x159   :  { %v1864_v50 = vpop.f32.mrb[6].mxu0 }
 0x15a   :  { %v352_v51 = vadd.f32 %v351_v44, %v349_v47  ;;  %v340_v52 = vadd.f32 %v339_v46, %v1864_v50  ;;  %v350_v53 = vmul.f32 %v1864_v50, %v1864_v50  ;;  %v334_v54 = vpop.f32.mrb[7].mxu0  ;;  %v1897_v42 = vsub.s32 %v443_v41, %v1663_v10  ;;  %v336_v47 = vld [vmem:[%s2105_s4] sm:$0x1] }
 0x15b   :  { %v1908_v54 = vsub.s32 0, %v1663_v10 }
 0x15c   :  { %v341_v55 = vrot.slane %v340_v52, 4  ;;  %v353_v56 = vadd.f32 %v352_v51, %v350_v53 }
 0x15e   :  { %v342_v58 = vadd.f32 %v341_v55, %v340_v52  ;;  %v354_v59 = vrot.slane %v353_v56, 4  ;;  %v337_v52 = vld [vmem:[%s2106_s5] sm:$0x1] }
 0x160   :  { %v343_v60 = vrot.slane %v342_v58, 2  ;;  %v355_v61 = vadd.f32 %v354_v59, %v353_v56  ;;  %v1541_v59 = vld [vmem:[%s2104_s2 + $0x48] sm:$0xff]  }
 0x162   :  { %v344_v62 = vadd.f32 %v343_v60, %v342_v58  ;;  %v356_v63 = vrot.slane %v355_v61, 2  ;;  %v1539_v58 = vld [vmem:[%s2104_s2] sm:$0xff]  }
 0x164   :  { %v345_v0 = vrot.slane %v344_v62, 1  ;;  %v357_v4 = vadd.f32 %v356_v63, %v355_v61  ;;  %v1542_v61 = vld [vmem:[%s2104_s2 + $0x8] sm:$0xff]   ;;  %v1545_v63 = vld [vmem:[%s2104_s2 + $0x10] sm:$0xff]  }
 0x166   :  { %v358_v5 = vrot.slane %v357_v4, 1  ;;  %v346_v7 = vadd.f32 %v345_v0, %v344_v62  ;;  %v1544_v62 = vld [vmem:[%s2104_s2 + $0x50] sm:$0xff]   ;;  %v1547_v0 = vld [vmem:[%s2104_s2 + $0x58] sm:$0xff]  }
 0x168   :  { %v359_v8 = vadd.f32 %v358_v5, %v357_v4  ;;  %v1548_v4 = vld [vmem:[%s2104_s2 + $0x18] sm:$0xff]   ;;  %v1550_v5 = vld [vmem:[%s2104_s2 + $0x60] sm:$0xff]  }
 0x16a   :  { %v361_v9 = vsel %vm360_vm8, %v346_v7, %v359_v8  ;;  %v1551_v7 = vld [vmem:[%s2104_s2 + $0x20] sm:$0xff]   ;;  %v1553_v8 = vld [vmem:[%s2104_s2 + $0x68] sm:$0xff]  }
 0x16b   :  { %1382 = vmatmul.mubr.f32.vlgmr.msra.gmra.mrb[0].mxu1 %v361_v9  ;;  %v1554_v9 = vld [vmem:[%s2104_s2 + $0x28] sm:$0xff]  }
 0x16c   :  { %1386 = vmatprep.mubr.msk.f32.mxu1 %vm1573_vm7, %v1574_v35  ;;  %1385 = vmatpush3.msra.mxu1 %v1875_v11 }
 0x16d   :  { %1286 = vmatprep.subr.bf16.mxu1 %v1538_v12  ;;  %v1555_v12 = vld [vmem:[%s2104_s2 + $0xa8] sm:$0xff]  }
 0x16e   :  { %1399 = vmatprep.subr.bf16.mxu0 %v1555_v12 }
 0x16f   :  { %1400 = vmatpush3.bf16.msra.mxu0 %v1555_v12 }
 0x170   :  { %1401 = vmatprep.subr.bf16.mxu0 %v1558_v18 }
 0x173   :  { %1402 = vmatpush3.bf16.msra.mxu0 %v1558_v18 }
 0x23e   :  { %v428_v22 = vpop.f32.mrb[0].mxu1 }
 0x23f   :  { %v432_v24 = vmul.f32 0.001953125, %v428_v22  ;;  %v1383_v25 = vpop.f32.mrb[1].mxu1  ;;  %v1561_v22 = vld [vmem:[%s2104_s2 + $0xb8] sm:$0xff]  }
 0x240   :  { %1403 = vmatprep.subr.bf16.mxu0 %v1561_v22 }
 0x241   :  { %v433_v27 = vmul.f32 %v432_v24, %v432_v24  ;;  %1404 = vmatpush3.bf16.msra.mxu0 %v1561_v22 }
 0x243   :  { %v435_v28 = vrot.slane %v433_v27, 7 }
 0x245   :  { %v437_v31 = vsub.f32 %v432_v24, %v435_v28 }
 0x247   :  { %v438_v34 = vadd.f32 1e-05, %v437_v31 }
 0x249   :  { %1566 = vrsqrt.f32 %v438_v34 }
 0x253   :  { %v1567_v43 = vpop.eup %1566 }
 0x254   :  { %v447_v44 = vrot.slane %v1567_v43, %v1897_v42 }
 0x256   :  { %v448_v46 = vcombine.high %v447_v44, %v447_v44 }
 0x258   :  { %v455_v49 = vrot.slane %v448_v46, %v1897_v42 }
 0x25a   :  { %v457_v51 = vmul.f32 %v455_v49, %v336_v47 }
 0x25c   :  { %v458_v53 = vmul.f32 %v457_v51, %v432_v24  ;;  %v551_v24 = vsub.s32 1, %v1663_v10 }
 0x25e   :  { %v459_v55 = vsub.f32 %v337_v52, %v458_v53 }
 0x260   :  { %v464_v56 = vrot.slane %v459_v55, %v1908_v54 }
 0x262   :  { %v466_v60 = vsel %vm360_vm8, %v457_v51, %v464_v56 }
 0x263   :  { %1387 = vmatmul.mubr.msk.f32.vlgmr.msra.gmra.mrb[2].mxu1 %vm467_vm9, %v466_v60 }
 0x264   :  { %1287 = vmatpush3.bf16.msra.mxu1 %v1539_v58 }
 0x265   :  { %1288 = vmatprep.subr.bf16.mxu1 %v1541_v59 }
 0x268   :  { %1289 = vmatpush3.bf16.msra.mxu1 %v1542_v61 }
 0x269   :  { %1290 = vmatprep.subr.bf16.mxu1 %v1544_v62 }
 0x26c   :  { %1291 = vmatpush3.bf16.msra.mxu1 %v1545_v63 }
 0x26d   :  { %1292 = vmatprep.subr.bf16.mxu1 %v1547_v0 }
 0x270   :  { %1293 = vmatpush3.bf16.msra.mxu1 %v1548_v4 }
 0x271   :  { %1294 = vmatprep.subr.bf16.mxu1 %v1550_v5 }
 0x274   :  { %1295 = vmatpush3.bf16.msra.mxu1 %v1551_v7 }
 0x275   :  { %1296 = vmatprep.subr.bf16.mxu1 %v1553_v8 }
 0x278   :  { %1297 = vmatpush3.bf16.msra.mxu1 %v1554_v9 }
 0x279   :  { %1298 = vmatprep.subr.bf16.mxu1 %v1556_v14 }
 0x27c   :  { %1299 = vmatpush3.bf16.msra.mxu1 %v1557_v15 }
 0x27d   :  { %1300 = vmatprep.subr.bf16.mxu1 %v1559_v19 }
 0x280   :  { %1301 = vmatpush3.bf16.msra.mxu1 %v1560_v21 }
 0x281   :  { %1485 = vmatprep.subr.bf16.mxu1 %v1572_v32 }
 0x336   :  { %v537_v25 = vpop.f32.mrb[2].mxu1 }
 0x337   :  { %v544_v27 = vrot.slane %v537_v25, %v1908_v54  ;;  %v1388_v28 = vpop.f32.mrb[3].mxu1  ;;  %v552_v31 = vrot.slane %v537_v25, %v551_v24 }
 0x339   :  { %v545_v34 = vmul.f32 %v544_v27, %v1849_v37  ;;  %v546_v38 = vmul.f32 %v544_v27, %v1851_v39  ;;  %v547_v40 = vmul.f32 %v544_v27, %v1859_v45  ;;  %v548_v41 = vmul.f32 %v544_v27, %v1864_v50 }
 0x33b   :  { %v555_v43 = vadd.f32 %v552_v31, %v547_v40  ;;  %v556_v44 = vadd.f32 %v552_v31, %v548_v41  ;;  %v553_v46 = vadd.f32 %v552_v31, %v545_v34  ;;  %v554_v47 = vadd.f32 %v552_v31, %v546_v38 }
 0x33d   :  { %v559_v49 = vmax.f32 %v555_v43, 0.0  ;;  %v560_v51 = vmax.f32 %v556_v44, 0.0  ;;  %v557_v52 = vmax.f32 %v553_v46, 0.0  ;;  %v558_v53 = vmax.f32 %v554_v47, 0.0 }
 0x33f   :  { %v564_v55 = vrot.slane %v560_v51, 7  ;;  %v576_v56 = vrot.slane %v560_v51, 1  ;;  %v561_v37 = vrot.slane %v557_v52, 7  ;;  %v562_v58 = vrot.slane %v558_v53, 7 }
 0x340   :  { %v586_v39 = vpack.c.bf16 %v558_v53, %v557_v52  ;;  %v573_v45 = vrot.slane %v557_v52, 1  ;;  %v574_v50 = vrot.slane %v558_v53, 1  ;;  %v575_v59 = vrot.slane %v559_v49, 1 }
 0x341   :  { %v567_v60 = vsel %vm122_vm4, %v561_v37, %v562_v58  ;;  %v568_v48 = vsel %vm122_vm4, %v564_v55, %v561_v37  ;;  %v589_v61 = vpack.c.bf16 %v560_v51, %v559_v49  ;;  %v563_v62 = vrot.slane %v559_v49, 7 }
 0x342   :  { %815 = vmatprep.mubr.bf16.mxu1 %v586_v39  ;;  %v1246_v63 = vpack.c.bf16 %v567_v60, %v568_v48  ;;  %v577_v0 = vsel %vm143_vm1, %v575_v59, %v576_v56  ;;  %v578_v4 = vsel %vm143_vm1, %v574_v50, %v575_v59  ;;  %v579_v5 = vsel %vm143_vm1, %v573_v45, %v574_v50 }
 0x343   :  { %v580_v7 = vsel %vm143_vm1, %v576_v56, %v573_v45  ;;  %v1254_v8 = vpack.c.bf16 %v578_v4, %v579_v5  ;;  %v565_v9 = vsel %vm122_vm4, %v563_v62, %v564_v55  ;;  %v566_v12 = vsel %vm122_vm4, %v562_v58, %v563_v62  ;;  %vm1249_vm1 = vmpackc.low %vm1576_vm13, %vm1248_vm0  ;;  %v1562_v62 = vld [vmem:[%s2107_s3] sm:$0xff]  }
 0x344   :  { %1247 = vmatmul.mubr.msk.bf16.vlgmr.msra.gmra.mrb[4].mxu1 %vm1245_vm14, %v1246_v63  ;;  %v1258_v14 = vpack.c.bf16 %v580_v7, %v577_v0  ;;  %v1250_v17 = vpack.c.bf16 %v565_v9, %v566_v12  ;;  %1449 = vmatprep.subr.bf16.mxu0 %v1562_v62  ;;  %v1563_v63 = vld [vmem:[%s2107_s3 + $0x8] sm:$0xff]   ;;  %v1564_v0 = vld [vmem:[%s2107_s3 + $0x10] sm:$0xff]   ;;  %v1101_v4 = vpack.c.bf16 %v1653_v6, %v1645_v3 }
 0x345   :  { %1405 = vmatprep.mubr.msk.bf16.mxu0 %vm1253_vm15, %v1254_v8  ;;  %823 = vmatprep.mubr.bf16.mxu1 %v589_v61 }
 0x346   :  { %1406 = vmatmul.mubr.msk.bf16.vlgmr.msra.gmra.mrb[8].mxu0 %vm1257_vm5, %v1258_v14  ;;  %1487 = vmatpush3.bf16.msra.mxu1 %v1703_v30 }
 0x347   :  { %1488 = vmatprep.subr.bf16.mxu1 %v1572_v32  ;;  %1450 = vmatpush3.bf16.msra.mxu0 %v1562_v62 }
 0x348   :  { %1451 = vmatprep.subr.bf16.mxu0 %v1563_v63 }
 0x34a   :  { %1490 = vmatpush3.bf16.msra.mxu1 %v1783_v13 }
 0x34b   :  { %1491 = vmatprep.subr.bf16.mxu1 %v1572_v32  ;;  %1452 = vmatpush3.bf16.msra.mxu0 %v1563_v63 }
 0x34c   :  { %1251 = vmatmul.mubr.msk.bf16.gmra.mrb[8].mxu1 %vm1249_vm1, %v1250_v17  ;;  %1453 = vmatprep.subr.bf16.mxu0 %v1564_v0 }
 0x34d   :  { %1441 = vmatprep.mubr.msk.f32.mxu1 %vm1573_vm7, %v1574_v35 }
 0x34e   :  { %1493 = vmatpush3.bf16.msra.mxu1 %v1793_v16 }
 0x34f   :  { %1494 = vmatprep.subr.bf16.mxu1 %v1572_v32  ;;  %1454 = vmatpush3.bf16.msra.mxu0 %v1564_v0 }
 0x352   :  { %1496 = vmatpush3.bf16.msra.mxu1 %v1803_v20 }
 0x353   :  { %1497 = vmatprep.subr.bf16.mxu1 %v1572_v32 }
 0x356   :  { %1499 = vmatpush3.bf16.msra.mxu1 %v1813_v23 }
 0x357   :  { %1500 = vmatprep.subr.bf16.mxu1 %v1572_v32 }
 0x35a   :  { %1502 = vmatpush3.bf16.msra.mxu1 %v1823_v26 }
 0x35b   :  { %1503 = vmatprep.subr.bf16.mxu1 %v1572_v32 }
 0x35e   :  { %1505 = vmatpush3.bf16.msra.mxu1 %v1833_v29 }
 0x35f   :  { %1506 = vmatprep.subr.bf16.mxu1 %v1572_v32 }
 0x362   :  { %1508 = vmatpush3.bf16.msra.mxu1 %v1844_v36 }
 0x363   :  { %1444 = vmatprep.subr.mxu1 %v1574_v35 }
 0x417   :  { %v1302_v30 = vpop.f32.mrb[4].mxu1 }
 0x418   :  { %v1303_v33 = vpop.f32.mrb[5].mxu1 }
 0x419   :  { %v1304_v57 = vadd.f32 %v1303_v33, %v1302_v30  ;;  %v1407_v13 = vpop.f32.mrb[8].mxu0  ;;  %v1305_v16 = vpop.f32.mrb[6].mxu1  ;;  %v881_v33 = vld [vmem:[%s2108_s6] sm:$0x1] }
 0x41a   :  { %v866_v20 = vpop.f32.mrb[9].mxu0  ;;  %v1306_v23 = vpop.f32.mrb[7].mxu1 }
 0x41b   :  { %v2028_v15 = vadd.f32 %v1304_v57, %v866_v20  ;;  %v1307_v26 = vadd.f32 %v1306_v23, %v1305_v16  ;;  %v1408_v18 = vpop.f32.mrb[10].mxu0  ;;  %v882_v57 = vld [vmem:[%s2109_s7] sm:$0x1] }
 0x41c   :  { %v869_v19 = vpop.f32.mrb[11].mxu0 }
 0x41d   :  { %v2030_v21 = vadd.f32 %v1307_v26, %v869_v19  ;;  %v892_v28 = vmul.f32 %v2028_v15, %v2028_v15 }
 0x41f   :  { %v1308_v29 = vpop.f32.mrb[8].mxu1  ;;  %v893_v36 = vmul.f32 %v2030_v21, %v2030_v21  ;;  %v883_v31 = vadd.f32 %v2030_v21, %v2028_v15 }
 0x420   :  { %v1309_v32 = vpop.f32.mrb[9].mxu1 }
 0x421   :  { %v1310_v22 = vadd.f32 %v1309_v32, %v1308_v29  ;;  %v1311_v25 = vpop.f32.mrb[10].mxu1  ;;  %v896_v40 = vadd.f32 %v893_v36, %v892_v28 }
 0x422   :  { %v1312_v27 = vpop.f32.mrb[11].mxu1 }
 0x423   :  { %v2038_v34 = vadd.f32 %v1407_v13, %v1310_v22  ;;  %v1313_v38 = vadd.f32 %v1312_v27, %v1311_v25 }
 0x425   :  { %v884_v41 = vadd.f32 %v883_v31, %v2038_v34  ;;  %v894_v43 = vmul.f32 %v2038_v34, %v2038_v34  ;;  %v2043_v44 = vadd.f32 %v1408_v18, %v1313_v38 }
 0x427   :  { %v897_v46 = vadd.f32 %v896_v40, %v894_v43  ;;  %v885_v47 = vadd.f32 %v884_v41, %v2043_v44  ;;  %v895_v49 = vmul.f32 %v2043_v44, %v2043_v44 }
 0x429   :  { %v886_v51 = vrot.slane %v885_v47, 4  ;;  %v898_v52 = vadd.f32 %v897_v46, %v895_v49 }
 0x42b   :  { %v887_v53 = vadd.f32 %v886_v51, %v885_v47  ;;  %v899_v55 = vrot.slane %v898_v52, 4 }
 0x42d   :  { %v888_v56 = vrot.slane %v887_v53, 2  ;;  %v900_v37 = vadd.f32 %v899_v55, %v898_v52 }
 0x42f   :  { %v889_v58 = vadd.f32 %v888_v56, %v887_v53  ;;  %v901_v39 = vrot.slane %v900_v37, 2 }
 0x431   :  { %v890_v45 = vrot.slane %v889_v58, 1  ;;  %v902_v50 = vadd.f32 %v901_v39, %v900_v37 }
 0x433   :  { %v903_v59 = vrot.slane %v902_v50, 1  ;;  %v891_v60 = vadd.f32 %v890_v45, %v889_v58 }
 0x435   :  { %v904_v48 = vadd.f32 %v903_v59, %v902_v50 }
 0x437   :  { %v905_v61 = vsel %vm360_vm8, %v891_v60, %v904_v48 }
 0x438   :  { %1442 = vmatmul.mubr.f32.vlgmr.msra.gmra.mrb[12].mxu1 %v905_v61 }
 0x439   :  { %1445 = vmatpush3.msra.mxu1 %v1875_v11  ;;  %1446 = vmatprep.mubr.msk.f32.mxu1 %vm1573_vm7, %v1574_v35  ;;  %v1565_v35 = vld [vmem:[%s2107_s3 + $0x18] sm:$0xff]   ;;  %v1100_v11 = vpack.c.bf16 %v1640_v2, %v1635_v1 }
 0x43a   :  { %1455 = vmatprep.subr.bf16.mxu0 %v1565_v35 }
 0x43b   :  { %1456 = vmatpush3.bf16.msra.mxu0 %v1565_v35  ;;  %1457 = vmatprep.mubr.msk.bf16.mxu0 %vm176_vm2, %v1100_v11 }
 0x43e   :  { %1458 = vmatmul.mubr.msk.bf16.vlgmr.msra.gmra.mrb[12].mxu0 %vm176_vm2, %v1101_v4 }
 0x50b   :  { %v972_v5 = vpop.f32.mrb[12].mxu1 }
 0x50c   :  { %v976_v7 = vmul.f32 0.001953125, %v972_v5  ;;  %v1443_v8 = vpop.f32.mrb[13].mxu1 }
 0x50e   :  { %v977_v9 = vmul.f32 %v976_v7, %v976_v7 }
 0x510   :  { %v979_v12 = vrot.slane %v977_v9, 7 }
 0x511   :  { %v1459_v26 = vpop.f32.mrb[12].mxu0 }
 0x512   :  { %v981_v14 = vsub.f32 %v976_v7, %v979_v12  ;;  %v1174_v18 = vpop.f32.mrb[13].mxu0 }
 0x513   :  { %v1460_v19 = vpop.f32.mrb[14].mxu0 }
 0x514   :  { %v982_v17 = vadd.f32 1e-05, %v981_v14  ;;  %v1177_v29 = vpop.f32.mrb[15].mxu0 }
 0x516   :  { %1568 = vrsqrt.f32 %v982_v17 }
 0x520   :  { %v1569_v30 = vpop.eup %1568 }
 0x521   :  { %v991_v1 = vrot.slane %v1569_v30, %v1897_v42 }
 0x523   :  { %v992_v2 = vcombine.high %v991_v1, %v991_v1 }
 0x525   :  { %v999_v3 = vrot.slane %v992_v2, %v1897_v42 }
 0x527   :  { %v1001_v6 = vmul.f32 %v999_v3, %v881_v33 }
 0x529   :  { %v1002_v13 = vmul.f32 %v1001_v6, %v976_v7 }
 0x52b   :  { %v1003_v16 = vsub.f32 %v882_v57, %v1002_v13 }
 0x52d   :  { %v1008_v20 = vrot.slane %v1003_v16, %v1908_v54 }
 0x52f   :  { %v1010_v23 = vsel %vm360_vm8, %v1001_v6, %v1008_v20 }
 0x530   :  { %1447 = vmatmul.mubr.msk.f32.vlgmr.msra.gmra.mrb[14].mxu1 %vm467_vm9, %v1010_v23 }
 0x603   :  { %v1080_v32 = vpop.f32.mrb[14].mxu1 }
 0x604   :  { %v1087_v42 = vrot.slane %v1080_v32, %v1908_v54  ;;  %v1448_v36 = vpop.f32.mrb[15].mxu1  ;;  %v1095_v22 = vrot.slane %v1080_v32, %v551_v24 }
 0x606   :  { %v1090_v25 = vmul.f32 %v1087_v42, %v2038_v34  ;;  %v1088_v27 = vmul.f32 %v1087_v42, %v2028_v15  ;;  %v1091_v28 = vmul.f32 %v1087_v42, %v2043_v44  ;;  %v1089_v31 = vmul.f32 %v1087_v42, %v2030_v21 }
 0x608   :  { %v1098_v38 = vadd.f32 %v1095_v22, %v1090_v25  ;;  %v1096_v40 = vadd.f32 %v1095_v22, %v1088_v27  ;;  %v1099_v41 = vadd.f32 %v1095_v22, %v1091_v28  ;;  %v1097_v43 = vadd.f32 %v1095_v22, %v1089_v31 }
 0x60a   :  { %v1191_v46 = vadd.f32 %v1459_v26, %v1098_v38  ;;  %v1189_v47 = vadd.f32 %v1174_v18, %v1096_v40  ;;  %v1192_v49 = vadd.f32 %v1460_v19, %v1099_v41  ;;  %v1190_v54 = vadd.f32 %v1177_v29, %v1097_v43 }
 0x60c   :  { %v1195_v51 = vmax.f32 %v1191_v46, 0.0  ;;  %v1193_v52 = vmax.f32 %v1189_v47, 0.0  ;;  %v1196_v10 = vmax.f32 %v1192_v49, 0.0  ;;  %v1194_v24 = vmax.f32 %v1190_v54, 0.0 }
 0x60e   :  { %1199 = vst [vmem:[%s2110_s10 + $0x10] sm:$0xff] %v1195_v51  ;;  %1197 = vst [vmem:[%s2110_s10] sm:$0xff] %v1193_v52 }
 0x60f   :  { %1200 = vst [vmem:[%s2110_s10 + $0x18] sm:$0xff] %v1196_v10  ;;  %1198 = vst [vmem:[%s2110_s10 + $0x8] sm:$0xff] %v1194_v24 }

</bundles_post_ra>
